<compile_context>
chip_gen: v6e
topology: v6e:2x2x1
jax: 0.10.0
libtpu: 0.0.40
codegen_flags: <defaults>
</compile_context>

<pallas_src>
import functools
import math

import numpy as np

import jax
import jax.numpy as jnp
from jax.experimental import pallas as pl
from jax.experimental.pallas import tpu as pltpu


def _round_up(x, m):
    return (x + m - 1) // m * m


# ----------------------------- tiled linear kernel -----------------------------

def _linear_kernel(x_ref, w_ref, b_ref, o_ref, acc_ref):
    @pl.when(pl.program_id(2) == 0)
    def _init():
        acc_ref[...] = jnp.zeros_like(acc_ref)

    acc_ref[...] += jnp.dot(x_ref[...], w_ref[...],
                            preferred_element_type=jnp.float32)

    @pl.when(pl.program_id(2) == pl.num_programs(2) - 1)
    def _finish():
        o_ref[...] = acc_ref[...] + b_ref[...]


def pallas_linear(x, w, b, *, tm=256, tn=256, tk=512):
    """y = x @ w + b with a (tm, tn, tk) grid, VMEM f32 accumulator, K axis last."""
    M, K = x.shape
    K2, O = w.shape
    assert K == K2
    x = x.astype(jnp.float32)
    w = w.astype(jnp.float32)
    b = b.reshape(1, -1).astype(jnp.float32)

    tm = min(tm, _round_up(M, 8))
    tn = min(tn, _round_up(O, 128))
    tk = min(tk, _round_up(K, 128))
    Mp, Kp, Op = _round_up(M, tm), _round_up(K, tk), _round_up(O, tn)

    xp = jnp.pad(x, ((0, Mp - M), (0, Kp - K)))
    wp = jnp.pad(w, ((0, Kp - K), (0, Op - O)))
    bp = jnp.pad(b, ((0, 0), (0, Op - O)))

    out = pl.pallas_call(
        _linear_kernel,
        out_shape=jax.ShapeDtypeStruct((Mp, Op), jnp.float32),
        grid=(Mp // tm, Op // tn, Kp // tk),
        in_specs=[
            pl.BlockSpec((tm, tk), lambda i, j, k: (i, k)),
            pl.BlockSpec((tk, tn), lambda i, j, k: (k, j)),
            pl.BlockSpec((1, tn), lambda i, j, k: (0, j)),
        ],
        out_specs=pl.BlockSpec((tm, tn), lambda i, j, k: (i, j)),
        scratch_shapes=[pltpu.VMEM((tm, tn), jnp.float32)],
        compiler_params=pltpu.CompilerParams(
            dimension_semantics=("parallel", "parallel", "arbitrary")),
    )(xp, wp, bp)
    return out[:M, :O]


# ----------------------------- MSDA core kernel -----------------------------

def _msda_core_kernel(value_ref, pk_ref, out_ref, *, heads, d_head, L, P,
                      level_hw, level_off, level_rows):
    """One (batch, Q-tile) block of multi-scale deformable attention.

    value_ref : [1, HWcat, heads*d_head]  levels concatenated, each padded to a
                multiple of 128 rows (static offsets `level_off`, rows `level_rows`).
    pk_ref    : [1, TQ, 3*heads*L*P] f32, packed (loc_x | loc_y | attn_weight),
                each block ordered (head, level, point).
    out_ref   : [1, TQ, heads*d_head] f32, lane-dense (all heads fused).
    """
    TQ = out_ref.shape[1]
    HLP = heads * L * P

    accs = [jnp.zeros((TQ, d_head), jnp.float32) for _ in range(heads)]

    for l in range(L):
        H, W = level_hw[l]
        HWp = level_rows[l]
        off = level_off[l]
        Hf, Wf = float(H), float(W)
        shift_w = W % HWp
        col = jax.lax.broadcasted_iota(jnp.int32, (TQ, HWp), 1)
        # full per-level value slab, loaded once per level (aligned: off, HWp are *128)
        v_lvl = value_ref[0, off:off + HWp, :]                       # [HWp, heads*d]

        for h in range(heads):
            base = h * L * P + l * P
            lx = pk_ref[0, :, 0 * HLP + base: 0 * HLP + base + P]    # [TQ, P]
            ly = pk_ref[0, :, 1 * HLP + base: 1 * HLP + base + P]
            aw = pk_ref[0, :, 2 * HLP + base: 2 * HLP + base + P]

            # CUDA ms_deform_attn convention: image coord = loc * size - 0.5
            x = lx * Wf - 0.5
            y = ly * Hf - 0.5
            x0f = jnp.floor(x)
            y0f = jnp.floor(y)
            fx = x - x0f
            fy = y - y0f
            x0 = x0f.astype(jnp.int32)
            y0 = y0f.astype(jnp.int32)

            # per-corner validity (matches the per-corner bounds checks of the ref op)
            vx0 = (x0 >= 0) & (x0 < W)
            vx1 = (x0 >= -1) & (x0 < W - 1)
            vy0 = (y0 >= 0) & (y0 < H)
            vy1 = (y0 >= -1) & (y0 < H - 1)

            w00 = jnp.where(vy0 & vx0, (1.0 - fy) * (1.0 - fx) * aw, 0.0)
            w01 = jnp.where(vy0 & vx1, (1.0 - fy) * fx * aw, 0.0)
            w10 = jnp.where(vy1 & vx0, fy * (1.0 - fx) * aw, 0.0)
            w11 = jnp.where(vy1 & vx1, fy * fx * aw, 0.0)

            # Base (top-left) flattened index, wrapped into [0, HWp) so the circular
            # rolls below land every *valid* corner at its true row index.
            idxf = y0f * Wf + x0f
            idxf = idxf - float(HWp) * jnp.floor(idxf * (1.0 / HWp))
            idx = idxf.astype(jnp.int32)                             # [TQ, P]

            # One one-hot compare per point; x+1 / y+1 corners via XLU rolls.
            A = jnp.zeros((TQ, HWp), jnp.float32)
            for p_i in range(P):
                oh00 = (col == idx[:, p_i:p_i + 1]).astype(jnp.float32)
                oh10 = pltpu.roll(oh00, shift_w, axis=1)             # y + 1 row
                A = A + oh00 * w00[:, p_i:p_i + 1]
                A = A + pltpu.roll(oh00, 1, axis=1) * w01[:, p_i:p_i + 1]
                A = A + oh10 * w10[:, p_i:p_i + 1]
                A = A + pltpu.roll(oh10, 1, axis=1) * w11[:, p_i:p_i + 1]

            v_h = v_lvl[:, h * d_head:(h + 1) * d_head]              # [HWp, d]
            accs[h] = accs[h] + jnp.dot(A.astype(v_lvl.dtype), v_h,
                                        preferred_element_type=jnp.float32)

    out_ref[0, :, :] = jnp.concatenate(accs, axis=-1)


def deform_attn_core(value, shapes_np, level_index_np, loc, attn,
                     compute_dtype=jnp.bfloat16):
    """value: [N, Lin, heads, d]; loc: [N, Q, heads, L, P, 2]; attn: [N, Q, heads, L, P]."""
    N, Lin, heads, d = value.shape
    _, Q, _, L, P, _ = loc.shape
    dim = heads * d

    # ---- static per-level geometry (baked into the kernel) ----
    level_hw = tuple((int(shapes_np[l, 0]), int(shapes_np[l, 1])) for l in range(L))
    level_rows = tuple(_round_up(h * w, 128) for h, w in level_hw)
    level_off = tuple(int(o) for o in np.cumsum((0,) + level_rows[:-1]))
    HWcat = int(sum(level_rows))

    # ---- value: concatenate levels, each padded to a multiple of 128 rows ----
    vflat = value.reshape(N, Lin, dim)
    pieces = []
    for l in range(L):
        Hl, Wl = level_hw[l]
        start = int(level_index_np[l])
        vl = vflat[:, start:start + Hl * Wl]
        pad = level_rows[l] - Hl * Wl
        if pad:
            vl = jnp.pad(vl, ((0, 0), (0, pad), (0, 0)))
        pieces.append(vl)
    vcat = jnp.concatenate(pieces, axis=1).astype(compute_dtype)     # [N, HWcat, dim]

    # ---- pack (loc_x | loc_y | attn) into one lane-dense input ----
    pk = jnp.stack([loc[..., 0], loc[..., 1], attn], axis=2)         # [N, Q, 3, heads, L, P]
    pk = pk.reshape(N, Q, 3 * heads * L * P).astype(jnp.float32)

    TQ = min(128, _round_up(Q, 8))
    Qp = _round_up(Q, TQ)
    if Qp != Q:
        pk = jnp.pad(pk, ((0, 0), (0, Qp - Q), (0, 0)))

    kernel = functools.partial(
        _msda_core_kernel, heads=heads, d_head=d, L=L, P=P,
        level_hw=level_hw, level_off=level_off, level_rows=level_rows)

    out = pl.pallas_call(
        kernel,
        out_shape=jax.ShapeDtypeStruct((N, Qp, dim), jnp.float32),
        grid=(N, Qp // TQ),
        in_specs=[
            pl.BlockSpec((1, HWcat, dim), lambda n, qt: (n, 0, 0)),
            pl.BlockSpec((1, TQ, 3 * heads * L * P), lambda n, qt: (n, qt, 0)),
        ],
        out_specs=pl.BlockSpec((1, TQ, dim), lambda n, qt: (n, qt, 0)),
        compiler_params=pltpu.CompilerParams(
            dimension_semantics=("parallel", "parallel")),
    )(vcat, pk)

    return out[:, :Q, :]


# ----------------------------- module forward -----------------------------

def init_params(key, dim, dim_value, dim_output, heads, L, P):
    ks = jax.random.split(key, 8)

    def xavier(k, fan_in, fan_out):
        limit = math.sqrt(6.0 / (fan_in + fan_out))
        return jax.random.uniform(k, (fan_in, fan_out), jnp.float32, -limit, limit)

    # sampling_offsets bias: rotational grid, exactly as reset_parameters()
    thetas = jnp.arange(heads, dtype=jnp.float32) * (2.0 * math.pi / heads)
    grid = jnp.stack([jnp.cos(thetas), jnp.sin(thetas)], -1)               # [heads, 2]
    grid = grid / jnp.max(jnp.abs(grid), axis=-1, keepdims=True)
    grid = jnp.tile(grid.reshape(heads, 1, 1, 2), (1, L, P, 1))
    grid = grid * jnp.arange(1, P + 1, dtype=jnp.float32).reshape(1, 1, P, 1)

    return {
        # weights stored pre-transposed: [in, out]
        "w_off": 0.01 * jax.random.normal(ks[0], (dim, heads * L * P * 2), jnp.float32),
        "b_off": grid.reshape(-1),
        "w_attn": 0.1 * jax.random.normal(ks[1], (dim, heads * L * P), jnp.float32),
        "b_attn": 0.1 * jax.random.normal(ks[2], (heads * L * P,), jnp.float32),
        "w_val": xavier(ks[3], dim_value, dim),
        "b_val": jnp.zeros((dim,), jnp.float32),
        "w_out": xavier(ks[4], dim, dim_output),
        "b_out": jnp.zeros((dim_output,), jnp.float32),
    }


def msda_forward(params, q, p, v, shapes, level_index, padding_mask=None,
                 *, heads, L, P, compute_dtype=jnp.bfloat16):
    N, Q, dim = q.shape
    _, Lin, dim_value = v.shape
    shapes_np = np.asarray(shapes)
    level_index_np = np.asarray(level_index)
    assert int((shapes_np[:, 0] * shapes_np[:, 1]).sum()) == Lin
    d_head = dim // heads
    assert dim % heads == 0
    HLP = heads * L * P

    # value projection
    v_proj = pallas_linear(v.reshape(N * Lin, dim_value), params["w_val"], params["b_val"])
    v_proj = v_proj.reshape(N, Lin, dim)
    if padding_mask is not None:
        v_proj = jnp.where(padding_mask[..., None], 0.0, v_proj)
    value = v_proj.reshape(N, Lin, heads, d_head)

    # fused query-side projection: [sampling_offsets | attention_weights]
    wq = jnp.concatenate([params["w_off"], params["w_attn"]], axis=1)
    bq = jnp.concatenate([params["b_off"], params["b_attn"]])
    qproj = pallas_linear(q.reshape(N * Q, dim), wq, bq)
    loc_off = qproj[:, :HLP * 2].reshape(N, Q, heads, L, P, 2)
    # NOTE: no softmax over (L, P) — faithful to the given module.
    attn = qproj[:, HLP * 2:].reshape(N, Q, heads, L, P)

    if p.shape[-1] == 2:
        loc_norm = jnp.stack([shapes[..., 1], shapes[..., 0]], -1).astype(jnp.float32)
        loc = p[:, :, None, :, None, :] + loc_off / loc_norm[None, None, None, :, None, :]
    elif p.shape[-1] == 4:
        loc = (p[:, :, None, :, None, :2]
               + loc_off / P * p[:, :, None, :, None, 2:] * 0.5)
    else:
        raise ValueError(f"Last dim of points must be 2 or 4. Got: {p.shape[-1]}")

    out = deform_attn_core(value, shapes_np, level_index_np, loc, attn,
                           compute_dtype=compute_dtype)                    # [N, Q, dim]
    out = pallas_linear(out.reshape(N * Q, dim), params["w_out"], params["b_out"])
    return out.reshape(N, Q, -1)


# ----------------------------- pure-JAX reference -----------------------------

def _ref_deform_attn_core(value, shapes_np, lidx_np, loc, attn):
    N, Lin, heads, d = value.shape
    _, Q, _, L, P, _ = loc.shape
    out = jnp.zeros((N, Q, heads, d), jnp.float32)
    for l in range(L):
        Hl, Wl = int(shapes_np[l, 0]), int(shapes_np[l, 1])
        start = int(lidx_np[l])
        vl = value[:, start:start + Hl * Wl].reshape(N, Hl, Wl, heads, d)
        x = loc[:, :, :, l, :, 0] * Wl - 0.5
        y = loc[:, :, :, l, :, 1] * Hl - 0.5
        x0 = jnp.floor(x)
        y0 = jnp.floor(y)
        fx = x - x0
        fy = y - y0
        x0 = x0.astype(jnp.int32)
        y0 = y0.astype(jnp.int32)
        n_idx = jnp.arange(N).reshape(N, 1, 1, 1)
        h_idx = jnp.arange(heads).reshape(1, 1, heads, 1)
        for dy, dx, w in [(0, 0, (1 - fy) * (1 - fx)), (0, 1, (1 - fy) * fx),
                          (1, 0, fy * (1 - fx)), (1, 1, fy * fx)]:
            yc = y0 + dy
            xc = x0 + dx
            valid = (yc >= 0) & (yc < Hl) & (xc >= 0) & (xc < Wl)
            ycc = jnp.clip(yc, 0, Hl - 1)
            xcc = jnp.clip(xc, 0, Wl - 1)
            g = vl[n_idx, ycc, xcc, h_idx, :]                  # [N, Q, heads, P, d]
            ww = (w * valid.astype(jnp.float32) * attn[:, :, :, l, :])[..., None]
            out = out + jnp.sum(ww * g, axis=3)
    return out.reshape(N, Q, heads * d)


def ref_forward(params, q, p, v, shapes, level_index, *, heads, L, P):
    N, Q, dim = q.shape
    _, Lin, dim_value = v.shape
    d_head = dim // heads
    v_proj = v.reshape(N * Lin, dim_value) @ params["w_val"] + params["b_val"]
    value = v_proj.reshape(N, Lin, heads, d_head)
    attn = (q.reshape(N * Q, dim) @ params["w_attn"] + params["b_attn"]).reshape(N, Q, heads, L, P)
    loc_off = (q.reshape(N * Q, dim) @ params["w_off"] + params["b_off"]).reshape(N, Q, heads, L, P, 2)
    loc_norm = jnp.stack([shapes[..., 1], shapes[..., 0]], -1).astype(jnp.float32)
    loc = p[:, :, None, :, None, :] + loc_off / loc_norm[None, None, None, :, None, :]
    out = _ref_deform_attn_core(value, np.asarray(shapes), np.asarray(level_index), loc, attn)
    out = out.reshape(N * Q, dim) @ params["w_out"] + params["b_out"]
    return out.reshape(N, Q, -1)


# ----------------------------- main -----------------------------

if __name__ == "__main__":
    N, Q, dim, heads, L, P = 2, 8, 32, 4, 2, 4          # d_per_head = 8 (power of 2)
    shapes = jnp.array([[8, 8], [4, 4]], jnp.int32)      # two feature levels
    level_index = jnp.array([0, 64], jnp.int32)
    Lin = 8 * 8 + 4 * 4                                  # 80 flattened value tokens

    key = jax.random.PRNGKey(0)
    kq, kp, kv, kparam = jax.random.split(key, 4)
    q = jax.random.normal(kq, (N, Q, dim), jnp.float32)
    p = jax.random.uniform(kp, (N, Q, L, 2), jnp.float32, 0.1, 0.9)
    v = jax.random.normal(kv, (N, Lin, dim), jnp.float32)
    params = init_params(kparam, dim, dim, dim, heads, L, P)

    # Production path: bf16 MXU operands (f32 accumulation) in the sampling core.
    out_bf16 = msda_forward(params, q, p, v, shapes, level_index,
                            heads=heads, L=L, P=P, compute_dtype=jnp.bfloat16)
    out_bf16 = jax.block_until_ready(out_bf16)
    assert out_bf16.shape == (N, Q, dim)

    # Exact-precision path of the same kernel (validates indexing/roll logic tightly).
    out_f32 = msda_forward(params, q, p, v, shapes, level_index,
                           heads=heads, L=L, P=P, compute_dtype=jnp.float32)
    out_f32 = jax.block_until_ready(out_f32)

    ref = ref_forward(params, q, p, v, shapes, level_index, heads=heads, L=L, P=P)
    ref = np.asarray(ref)

    if not np.allclose(np.asarray(out_f32), ref, rtol=2e-3, atol=2e-3):
        max_err = float(np.max(np.abs(np.asarray(out_f32) - ref)))
        raise AssertionError(f"f32 kernel mismatch vs reference, max abs err={max_err}")

    # bf16 operands introduce ~2^-9 relative rounding per operand; tolerance reflects that.
    if not np.allclose(np.asarray(out_bf16), ref, rtol=2e-2, atol=2e-2):
        max_err = float(np.max(np.abs(np.asarray(out_bf16) - ref)))
        raise AssertionError(f"bf16 kernel mismatch vs reference, max abs err={max_err}")

    print("KERNEL_OK")
</pallas_src>

<mosaic_0001>
module attributes {stable_mosaic.version = 11 : i64} {
  func.func @_linear_kernel(%arg0: i32, %arg1: i32, %arg2: i32, %arg3: memref<160x128xf32, #tpu.memory_space<vmem>>, %arg4: memref<128x128xf32, #tpu.memory_space<vmem>>, %arg5: memref<1x128xf32, #tpu.memory_space<vmem>>, %arg6: memref<160x128xf32, #tpu.memory_space<vmem>>, %arg7: memref<160x128xf32, #tpu.memory_space<vmem>>) attributes {dimension_semantics = [#tpu.dimension_semantics<parallel>, #tpu.dimension_semantics<parallel>, #tpu.dimension_semantics<arbitrary>], iteration_bounds = array<i64: 1, 1, 1>, scalar_prefetch = 0 : i64, scratch_operands = 1 : i64, tpu.core_type = #tpu.core_type<tc>, window_params = [{transform_indices = @transform_0, window_bounds = array<i64: 160, 128>}, {transform_indices = @transform_1, window_bounds = array<i64: 128, 128>}, {transform_indices = @transform_2, window_bounds = array<i64: 1, 128>}, {transform_indices = @transform_3, window_bounds = array<i64: 160, 128>}]} {
    %c0_i32 = arith.constant 0 : i32
    %0 = arith.cmpi eq, %arg2, %c0_i32 : i32
    %1 = arith.extui %0 : i1 to i32
    %c0_i32_0 = arith.constant 0 : i32
    %2 = arith.cmpi ne, %1, %c0_i32_0 : i32
    scf.if %2 {
      %cst_10 = arith.constant 0.000000e+00 : f32
      %12 = vector.broadcast %cst_10 : f32 to vector<160x128xf32>
      %c0_11 = arith.constant 0 : index
      %c0_12 = arith.constant 0 : index
      %13 = vector.load %arg7[%c0_11, %c0_12] : memref<160x128xf32, #tpu.memory_space<vmem>>, vector<160x128xf32>
      tpu.vector_store %arg7[%c0_11, %c0_12], %12 {strides = array<i32>} : memref<160x128xf32, #tpu.memory_space<vmem>>, vector<160x128xf32>,
    } else {
    }
    %c0 = arith.constant 0 : index
    %c0_1 = arith.constant 0 : index
    %3 = vector.load %arg7[%c0, %c0_1] : memref<160x128xf32, #tpu.memory_space<vmem>>, vector<160x128xf32>
    %c0_2 = arith.constant 0 : index
    %c0_3 = arith.constant 0 : index
    %4 = vector.load %arg3[%c0_2, %c0_3] : memref<160x128xf32, #tpu.memory_space<vmem>>, vector<160x128xf32>
    %c0_4 = arith.constant 0 : index
    %c0_5 = arith.constant 0 : index
    %5 = vector.load %arg4[%c0_4, %c0_5] : memref<128x128xf32, #tpu.memory_space<vmem>>, vector<128x128xf32>
    %cst = arith.constant dense<0.000000e+00> : vector<160x128xf32>
    %6 = tpu.matmul %4, %5, %cst {dimension_numbers = #tpu.dot_dimension_numbers<[1], [0], [0], [1], [0, 0, 1, 1], [], []>} : vector<160x128xf32>, vector<128x128xf32>, vector<160x128xf32> -> vector<160x128xf32>
    %7 = arith.addf %3, %6 : vector<160x128xf32>
    %c0_6 = arith.constant 0 : index
    %c0_7 = arith.constant 0 : index
    %8 = vector.load %arg7[%c0_6, %c0_7] : memref<160x128xf32, #tpu.memory_space<vmem>>, vector<160x128xf32>
    tpu.vector_store %arg7[%c0_6, %c0_7], %7 {strides = array<i32>} : memref<160x128xf32, #tpu.memory_space<vmem>>, vector<160x128xf32>,
    %c0_i32_8 = arith.constant 0 : i32
    %9 = arith.cmpi eq, %arg2, %c0_i32_8 : i32
    %10 = arith.extui %9 : i1 to i32
    %c0_i32_9 = arith.constant 0 : i32
    %11 = arith.cmpi ne, %10, %c0_i32_9 : i32
    scf.if %11 {
      %c0_10 = arith.constant 0 : index
      %c0_11 = arith.constant 0 : index
      %12 = vector.load %arg7[%c0_10, %c0_11] : memref<160x128xf32, #tpu.memory_space<vmem>>, vector<160x128xf32>
      %c0_12 = arith.constant 0 : index
      %c0_13 = arith.constant 0 : index
      %13 = vector.load %arg5[%c0_12, %c0_13] : memref<1x128xf32, #tpu.memory_space<vmem>>, vector<1x128xf32>
      %14 = vector.broadcast %13 : vector<1x128xf32> to vector<160x128xf32>
      %15 = arith.addf %12, %14 : vector<160x128xf32>
      %c0_14 = arith.constant 0 : index
      %c0_15 = arith.constant 0 : index
      %16 = vector.load %arg6[%c0_14, %c0_15] : memref<160x128xf32, #tpu.memory_space<vmem>>, vector<160x128xf32>
      tpu.vector_store %arg6[%c0_14, %c0_15], %15 {strides = array<i32>} : memref<160x128xf32, #tpu.memory_space<vmem>>, vector<160x128xf32>,
    } else {
    }
    return
  }
  func.func @transform_0(%arg0: i32, %arg1: i32, %arg2: i32) -> (i32, i32) {
    %c0_i32 = arith.constant 0 : i32
    return %arg0, %arg2 : i32, i32
  }
  func.func @transform_1(%arg0: i32, %arg1: i32, %arg2: i32) -> (i32, i32) {
    %c0_i32 = arith.constant 0 : i32
    return %arg2, %arg1 : i32, i32
  }
  func.func @transform_2(%arg0: i32, %arg1: i32, %arg2: i32) -> (i32, i32) {
    %c0_i32 = arith.constant 0 : i32
    %c0_i32_0 = arith.constant 0 : i32
    return %c0_i32, %arg1 : i32, i32
  }
  func.func @transform_3(%arg0: i32, %arg1: i32, %arg2: i32) -> (i32, i32) {
    %c0_i32 = arith.constant 0 : i32
    return %arg0, %arg1 : i32, i32
  }
}

</mosaic_0001>

<bundles_post_ra>
// kernel: tpu_custom_call.1
= control target key start
LH: loop header
LB: loop body
LE: loop exit
PB: predicated region body
PF: predicated region fallthrough
CT: control target
= control target key end

     0   :  { %8 = vsyncpa [#allocation4], 0  ;;  %s664_s0 = inlined_call_operand.hbm [shape: f32[160,128], index: 0, kind: input, shape index: {}]   ;;  %s665_s1 = inlined_call_operand.hbm [shape: f32[128,128], index: 1, kind: input, shape index: {}]   ;;  %s666_s2 = inlined_call_operand.vmem [shape: f32[1,128], index: 2, kind: input, shape index: {}]   ;;  %s667_s3 = inlined_call_operand.hbm [shape: f32[160,128], index: 3, kind: output, shape index: {}]  }
   0x1   :  { %9 = vsyncpa [#allocation7], 0 }
   0x2   :  { %10 = vsyncpa [#allocation5], 0  ;;  %s618_s12 = smov [#allocation3]  }
   0x3   :  { %s16_s13 = sshll.u32 %s618_s12, 4  ;;  %s17_s13 = int_to_ptr.vmem [resolvable:$true] %s16_s13 }
   0x4   :  { %s560_s14 = scalar_lea.vmem %s17_s13, 2560  ;;  %p565_p1 = scmp.lt.s32.totalorder %s17_s13, %s17_s13 }
   0x5   :  { %p561_p0 = scmp.ne.s32.totalorder %s17_s13, %s560_s14  ;;  %p566_p2 = scmp.lt.s32.totalorder %s560_s14, %s560_s14 }
   0x7   :  { %p567_p3 = por %p566_p2, %p565_p1 }
   0x9   :  { %p568_p4 = pnand %p567_p3, %p561_p0 }
   0xb   :  { %571 = shalt.err (!%p568_p4)
}
   0xc   :  { %s619_s15 = smov 128   ;;  %s620_s16 = smov 8  }
   0xd   :  { %22 = dma.hbm_to_vmem [thread:$0]  %s664_s0, 2560, %s17_s13, [#allocation4], %s619_s15, %s619_s15, %s620_s16  }
   0xe   :  { %s621_s19 = smov [#allocation6]  }
   0xf   :  { %s28_s20 = sshll.u32 %s621_s19, 4  ;;  %s29_s20 = int_to_ptr.vmem [resolvable:$true] %s28_s20 }
  0x10   :  { %s580_s21 = scalar_lea.vmem %s29_s20, 2048  ;;  %p585_p6 = scmp.lt.s32.totalorder %s29_s20, %s29_s20 }
  0x11   :  { %p581_p5 = scmp.ne.s32.totalorder %s29_s20, %s580_s21  ;;  %p586_p7 = scmp.lt.s32.totalorder %s580_s21, %s580_s21 }
  0x13   :  { %p587_p8 = por %p586_p7, %p585_p6 }
  0x15   :  { %p588_p9 = pnand %p587_p8, %p581_p5 }
  0x17   :  { %591 = shalt.err (!%p588_p9)
}
  0x18   :  { %34 = dma.hbm_to_vmem [thread:$0]  %s665_s1, 2048, %s29_s20, [#allocation7], %s619_s15, %s619_s15, %s620_s16  }
  0x19   :  { %612 = dma.done.wait [#allocation4], 2560  }
  0x1a   :  { %613 = vsyncadd [#allocation4], 4294964736 }
  0x1b   :  { %614 = dma.done.wait [#allocation7], 2048  }
  0x1c   :  { %615 = vsyncadd [#allocation7], 4294965248  ;;  %v122_v0 = vld [vmem:[#allocation6 + $0x78] sm:$0xff]  ;;  %v121_v1 = vld [vmem:[#allocation6 + $0x70] sm:$0xff] }
  0x1d   :  { %453 = vmatprep.subr.mxu0 %v122_v0  ;;  %515 = vmatprep.subr.mxu1 %v122_v0  ;;  %v120_v2 = vld [vmem:[#allocation6 + $0x68] sm:$0xff]  ;;  %v119_v3 = vld [vmem:[#allocation6 + $0x60] sm:$0xff]  ;;  %v118_v4 = vld [vmem:[#allocation6 + $0x58] sm:$0xff] }
  0x1e   :  { %454 = vmatpush3.msra.mxu0 %v122_v0  ;;  %531 = vmatpush3.msra.mxu1 %v122_v0  ;;  %v117_v5 = vld [vmem:[#allocation6 + $0x50] sm:$0xff]  ;;  %v116_v6 = vld [vmem:[#allocation6 + $0x48] sm:$0xff]  ;;  %v115_v7 = vld [vmem:[#allocation6 + $0x40] sm:$0xff] }
  0x1f   :  { %455 = vmatprep.subr.mxu0 %v121_v1  ;;  %516 = vmatprep.subr.mxu1 %v121_v1  ;;  %v114_v8 = vld [vmem:[#allocation6 + $0x38] sm:$0xff]  ;;  %v113_v9 = vld [vmem:[#allocation6 + $0x30] sm:$0xff]  ;;  %v112_v10 = vld [vmem:[#allocation6 + $0x28] sm:$0xff] }
  0x20   :  { %456 = vmatpush3.msra.mxu0 %v121_v1  ;;  %532 = vmatpush3.msra.mxu1 %v121_v1  ;;  %v111_v11 = vld [vmem:[#allocation6 + $0x20] sm:$0xff]  ;;  %v110_v12 = vld [vmem:[#allocation6 + $0x18] sm:$0xff]  ;;  %v109_v13 = vld [vmem:[#allocation6 + $0x10] sm:$0xff] }
  0x21   :  { %457 = vmatprep.subr.mxu0 %v120_v2  ;;  %517 = vmatprep.subr.mxu1 %v120_v2  ;;  %v108_v14 = vld [vmem:[#allocation6 + $0x8] sm:$0xff]  ;;  %v107_v15 = vld [vmem:[#allocation6] sm:$0xff]  ;;  %v97_v17 = vld [vmem:[#allocation3 + $0x50] sm:$0xff] }
  0x22   :  { %458 = vmatpush3.msra.mxu0 %v120_v2  ;;  %533 = vmatpush3.msra.mxu1 %v120_v2  ;;  %v87_v16 = vld [vmem:[#allocation3] sm:$0xff]  ;;  %v88_v18 = vld [vmem:[#allocation3 + $0x8] sm:$0xff]  ;;  %v98_v19 = vld [vmem:[#allocation3 + $0x58] sm:$0xff] }
  0x23   :  { %459 = vmatprep.subr.mxu0 %v119_v3  ;;  %518 = vmatprep.subr.mxu1 %v119_v3  ;;  %v89_v20 = vld [vmem:[#allocation3 + $0x10] sm:$0xff]  ;;  %v99_v21 = vld [vmem:[#allocation3 + $0x60] sm:$0xff]  ;;  %v90_v22 = vld [vmem:[#allocation3 + $0x18] sm:$0xff] }
  0x24   :  { %460 = vmatpush3.msra.mxu0 %v119_v3  ;;  %534 = vmatpush3.msra.mxu1 %v119_v3  ;;  %v100_v23 = vld [vmem:[#allocation3 + $0x68] sm:$0xff]  ;;  %v91_v24 = vld [vmem:[#allocation3 + $0x20] sm:$0xff]  ;;  %v101_v25 = vld [vmem:[#allocation3 + $0x70] sm:$0xff] }
  0x25   :  { %461 = vmatprep.subr.mxu0 %v118_v4  ;;  %519 = vmatprep.subr.mxu1 %v118_v4  ;;  %v92_v26 = vld [vmem:[#allocation3 + $0x28] sm:$0xff]  ;;  %v102_v27 = vld [vmem:[#allocation3 + $0x78] sm:$0xff]  ;;  %v93_v28 = vld [vmem:[#allocation3 + $0x30] sm:$0xff] }
  0x26   :  { %462 = vmatpush3.msra.mxu0 %v118_v4  ;;  %535 = vmatpush3.msra.mxu1 %v118_v4  ;;  %v103_v29 = vld [vmem:[#allocation3 + $0x80] sm:$0xff]  ;;  %v94_v30 = vld [vmem:[#allocation3 + $0x38] sm:$0xff]  ;;  %v104_v31 = vld [vmem:[#allocation3 + $0x88] sm:$0xff] }
  0x27   :  { %463 = vmatprep.subr.mxu0 %v117_v5  ;;  %520 = vmatprep.subr.mxu1 %v117_v5  ;;  %v95_v32 = vld [vmem:[#allocation3 + $0x40] sm:$0xff]  ;;  %v105_v33 = vld [vmem:[#allocation3 + $0x90] sm:$0xff]  ;;  %v96_v34 = vld [vmem:[#allocation3 + $0x48] sm:$0xff] }
  0x28   :  { %464 = vmatpush3.msra.mxu0 %v117_v5  ;;  %536 = vmatpush3.msra.mxu1 %v117_v5  ;;  %v106_v35 = vld [vmem:[#allocation3 + $0x98] sm:$0xff]  ;;  %v416_v36 = vld [vmem:[%s666_s2] ss:$0 sm:$0xff]  ;;  %s622_s2 = smov [#allocation8]  }
  0x29   :  { %465 = vmatprep.subr.mxu0 %v116_v6  ;;  %521 = vmatprep.subr.mxu1 %v116_v6  ;;  %s403_s24 = sshll.u32 %s622_s2, 4  ;;  %s404_s24 = int_to_ptr.vmem [resolvable:$true] %s403_s24 }
  0x2a   :  { %466 = vmatpush3.msra.mxu0 %v116_v6  ;;  %537 = vmatpush3.msra.mxu1 %v116_v6  ;;  %s592_s25 = scalar_lea.vmem %s404_s24, 2560  ;;  %p597_p11 = scmp.lt.s32.totalorder %s404_s24, %s404_s24 }
  0x2b   :  { %467 = vmatprep.subr.mxu0 %v115_v7  ;;  %522 = vmatprep.subr.mxu1 %v115_v7  ;;  %p593_p10 = scmp.ne.s32.totalorder %s404_s24, %s592_s25  ;;  %p598_p12 = scmp.lt.s32.totalorder %s592_s25, %s592_s25 }
  0x2c   :  { %468 = vmatpush3.msra.mxu0 %v115_v7  ;;  %538 = vmatpush3.msra.mxu1 %v115_v7 }
  0x2d   :  { %469 = vmatprep.subr.mxu0 %v114_v8  ;;  %523 = vmatprep.subr.mxu1 %v114_v8  ;;  %p599_p13 = por %p598_p12, %p597_p11 }
  0x2e   :  { %470 = vmatpush3.msra.mxu0 %v114_v8  ;;  %539 = vmatpush3.msra.mxu1 %v114_v8 }
  0x2f   :  { %471 = vmatprep.subr.mxu0 %v113_v9  ;;  %524 = vmatprep.subr.mxu1 %v113_v9  ;;  %p600_p0 = pnand %p599_p13, %p593_p10 }
  0x30   :  { %472 = vmatpush3.msra.mxu0 %v113_v9  ;;  %540 = vmatpush3.msra.mxu1 %v113_v9 }
  0x31   :  { %473 = vmatprep.subr.mxu0 %v112_v10  ;;  %525 = vmatprep.subr.mxu1 %v112_v10 }
  0x32   :  { %474 = vmatpush3.msra.mxu0 %v112_v10  ;;  %541 = vmatpush3.msra.mxu1 %v112_v10 }
  0x33   :  { %475 = vmatprep.subr.mxu0 %v111_v11  ;;  %526 = vmatprep.subr.mxu1 %v111_v11 }
  0x34   :  { %476 = vmatpush3.msra.mxu0 %v111_v11  ;;  %542 = vmatpush3.msra.mxu1 %v111_v11 }
  0x35   :  { %477 = vmatprep.subr.mxu0 %v110_v12  ;;  %527 = vmatprep.subr.mxu1 %v110_v12 }
  0x36   :  { %478 = vmatpush3.msra.mxu0 %v110_v12  ;;  %543 = vmatpush3.msra.mxu1 %v110_v12 }
  0x37   :  { %479 = vmatprep.subr.mxu0 %v109_v13  ;;  %528 = vmatprep.subr.mxu1 %v109_v13 }
  0x38   :  { %480 = vmatpush3.msra.mxu0 %v109_v13  ;;  %544 = vmatpush3.msra.mxu1 %v109_v13 }
  0x39   :  { %481 = vmatprep.subr.mxu0 %v108_v14  ;;  %529 = vmatprep.subr.mxu1 %v108_v14 }
  0x3a   :  { %482 = vmatpush3.msra.mxu0 %v108_v14  ;;  %545 = vmatpush3.msra.mxu1 %v108_v14 }
  0x3b   :  { %483 = vmatprep.subr.mxu0 %v107_v15  ;;  %530 = vmatprep.subr.mxu1 %v107_v15 }
  0x3c   :  { %484 = vmatpush3.msra.mxu0 %v107_v15  ;;  %546 = vmatpush3.msra.mxu1 %v107_v15 }
  0x3d   :  { %485 = vmatprep.mubr.f32.mxu0 %v87_v16  ;;  %500 = vmatprep.mubr.f32.mxu1 %v97_v17 }
  0x3e   :  { %486 = vmatmul.mubr.f32.vlgmr.msra.gmra.mxu0 %v88_v18  ;;  %501 = vmatmul.mubr.f32.vlgmr.msra.gmra.mxu1 %v98_v19 }
  0x3f   :  { %488 = vmatprep.mubr.f32.mxu0 %v89_v20  ;;  %503 = vmatprep.mubr.f32.mxu1 %v99_v21 }
  0x42   :  { %489 = vmatmul.mubr.f32.gmra.mxu0 %v90_v22  ;;  %504 = vmatmul.mubr.f32.gmra.mxu1 %v100_v23 }
  0x43   :  { %491 = vmatprep.mubr.f32.mxu0 %v91_v24  ;;  %506 = vmatprep.mubr.f32.mxu1 %v101_v25 }
  0x46   :  { %492 = vmatmul.mubr.f32.gmra.mxu0 %v92_v26  ;;  %507 = vmatmul.mubr.f32.gmra.mxu1 %v102_v27 }
  0x47   :  { %494 = vmatprep.mubr.f32.mxu0 %v93_v28  ;;  %509 = vmatprep.mubr.f32.mxu1 %v103_v29 }
  0x4a   :  { %495 = vmatmul.mubr.f32.gmra.mxu0 %v94_v30  ;;  %510 = vmatmul.mubr.f32.gmra.mxu1 %v104_v31 }
  0x4b   :  { %497 = vmatprep.mubr.f32.mxu0 %v95_v32  ;;  %512 = vmatprep.mubr.f32.mxu1 %v105_v33 }
  0x4e   :  { %498 = vmatmul.mubr.f32.gmra.mxu0 %v96_v34  ;;  %513 = vmatmul.mubr.f32.gmra.mxu1 %v106_v35 }
  0xfe   :  { %v487_v37 = vpop.f32.mrf.mxu0  ;;  %v502_v38 = vpop.f32.mrf.mxu1 }
  0xff   :  { %v359_v39 = vadd.f32 %v487_v37, %v416_v36  ;;  %v369_v40 = vadd.f32 %v502_v38, %v416_v36 }
 0x100   :  { %v189_v41 = vpop.f32.mrf.mxu0  ;;  %v239_v42 = vpop.f32.mrf.mxu1 }
 0x101   :  { %379 = vst [vmem:[#allocation8 + $0x8] sm:$0xff] %v359_v39  ;;  %389 = vst [vmem:[#allocation8 + $0x58] sm:$0xff] %v369_v40  ;;  %v358_v43 = vadd.f32 %v416_v36, %v189_v41  ;;  %v368_v44 = vadd.f32 %v416_v36, %v239_v42 }
 0x102   :  { %v490_v45 = vpop.f32.mrf.mxu0  ;;  %v505_v46 = vpop.f32.mrf.mxu1 }
 0x103   :  { %378 = vst [vmem:[#allocation8] sm:$0xff] %v358_v43  ;;  %388 = vst [vmem:[#allocation8 + $0x50] sm:$0xff] %v368_v44  ;;  %v361_v47 = vadd.f32 %v490_v45, %v416_v36  ;;  %v371_v48 = vadd.f32 %v505_v46, %v416_v36 }
 0x104   :  { %v199_v49 = vpop.f32.mrf.mxu0  ;;  %v249_v50 = vpop.f32.mrf.mxu1 }
 0x105   :  { %381 = vst [vmem:[#allocation8 + $0x18] sm:$0xff] %v361_v47  ;;  %391 = vst [vmem:[#allocation8 + $0x68] sm:$0xff] %v371_v48  ;;  %v360_v51 = vadd.f32 %v416_v36, %v199_v49  ;;  %v370_v52 = vadd.f32 %v416_v36, %v249_v50 }
 0x106   :  { %v493_v53 = vpop.f32.mrf.mxu0  ;;  %v508_v54 = vpop.f32.mrf.mxu1 }
 0x107   :  { %380 = vst [vmem:[#allocation8 + $0x10] sm:$0xff] %v360_v51  ;;  %390 = vst [vmem:[#allocation8 + $0x60] sm:$0xff] %v370_v52  ;;  %v363_v55 = vadd.f32 %v493_v53, %v416_v36  ;;  %v373_v56 = vadd.f32 %v508_v54, %v416_v36 }
 0x108   :  { %v209_v57 = vpop.f32.mrf.mxu0  ;;  %v259_v58 = vpop.f32.mrf.mxu1 }
 0x109   :  { %383 = vst [vmem:[#allocation8 + $0x28] sm:$0xff] %v363_v55  ;;  %393 = vst [vmem:[#allocation8 + $0x78] sm:$0xff] %v373_v56  ;;  %v362_v59 = vadd.f32 %v416_v36, %v209_v57  ;;  %v372_v60 = vadd.f32 %v416_v36, %v259_v58 }
 0x10a   :  { %v496_v61 = vpop.f32.mrf.mxu0  ;;  %v511_v62 = vpop.f32.mrf.mxu1 }
 0x10b   :  { %382 = vst [vmem:[#allocation8 + $0x20] sm:$0xff] %v362_v59  ;;  %392 = vst [vmem:[#allocation8 + $0x70] sm:$0xff] %v372_v60  ;;  %v365_v63 = vadd.f32 %v496_v61, %v416_v36  ;;  %v375_v0 = vadd.f32 %v511_v62, %v416_v36 }
 0x10c   :  { %v219_v1 = vpop.f32.mrf.mxu0  ;;  %v269_v2 = vpop.f32.mrf.mxu1 }
 0x10d   :  { %385 = vst [vmem:[#allocation8 + $0x38] sm:$0xff] %v365_v63  ;;  %395 = vst [vmem:[#allocation8 + $0x88] sm:$0xff] %v375_v0  ;;  %v364_v3 = vadd.f32 %v416_v36, %v219_v1  ;;  %v374_v4 = vadd.f32 %v416_v36, %v269_v2 }
 0x10e   :  { %v499_v5 = vpop.f32.mrf.mxu0  ;;  %v514_v6 = vpop.f32.mrf.mxu1 }
 0x10f   :  { %384 = vst [vmem:[#allocation8 + $0x30] sm:$0xff] %v364_v3  ;;  %394 = vst [vmem:[#allocation8 + $0x80] sm:$0xff] %v374_v4  ;;  %v367_v7 = vadd.f32 %v499_v5, %v416_v36  ;;  %v377_v8 = vadd.f32 %v514_v6, %v416_v36 }
 0x110   :  { %v229_v9 = vpop.f32.mrf.mxu0  ;;  %v279_v10 = vpop.f32.mrf.mxu1 }
 0x111   :  { %387 = vst [vmem:[#allocation8 + $0x48] sm:$0xff] %v367_v7  ;;  %397 = vst [vmem:[#allocation8 + $0x98] sm:$0xff] %v377_v8  ;;  %v366_v11 = vadd.f32 %v416_v36, %v229_v9  ;;  %v376_v12 = vadd.f32 %v416_v36, %v279_v10 }
 0x113   :  { %386 = vst [vmem:[#allocation8 + $0x40] sm:$0xff] %v366_v11  ;;  %396 = vst [vmem:[#allocation8 + $0x90] sm:$0xff] %v376_v12 }
 0x114   :  { %603 = shalt.err (!%p600_p0)
}
 0x115   :  { %409 = dma.vmem_to_hbm [thread:$0]  %s404_s24, 2560, %s667_s3, [#allocation5], %s619_s15, %s619_s15, %s620_s16  }
 0x116   :  { %616 = dma.done.wait [#allocation5], 2560  }
 0x117   :  { %617 = vsyncadd [#allocation5], 4294964736 }
 0x118   :  { %413 = vsyncpa [#allocation4], 1 }
 0x119   :  { %414 = vsyncpa [#allocation7], 1 }
 0x11a   :  { %415 = vsyncpa [#allocation5], 1 }

</bundles_post_ra>
